<compile_context>
chip_gen: v7x
topology: tpu7x:2x2x1
jax: 0.10.0
libtpu: 0.0.40
codegen_flags: <defaults>
</compile_context>

<pallas_src>
import functools

import jax
import jax.numpy as jnp
from jax import lax
from jax.experimental import pallas as pl
from jax.experimental.pallas import tpu as pltpu


def _unpool_kernel(idx_ref, val_ref, o_ref, *,
                   kernel_size, stride, wout, x1, y1, hc, wc):
    # idx_ref / val_ref blocks: (1, bc, Hin, Win);  o_ref block: (1, bc, Hc, Wc)
    idx = idx_ref[0]                      # (bc, Hin, Win) int32
    vals = val_ref[0]                     # (bc, Hin, Win) input dtype (kept as-is)
    bc, hin, win = vals.shape
    cdt = vals.dtype

    # Input-grid coordinates (2D, broadcast against the channel/batch dim).
    hi = lax.broadcasted_iota(jnp.int32, (hin, win), 0)
    wi = lax.broadcasted_iota(jnp.int32, (hin, win), 1)

    # Constant 0/1 scatter matrices, built once (crop offsets folded in):
    #   T_kh[ho_c, hi] = 1  iff  hi*stride + kh == ho_c + x1      (rows)
    #   S_kw[wi, wo_c] = 1  iff  wi*stride + kw == wo_c + y1      (cols)
    out_r = lax.broadcasted_iota(jnp.int32, (hc, hin), 0)
    in_r = lax.broadcasted_iota(jnp.int32, (hc, hin), 1)
    in_c = lax.broadcasted_iota(jnp.int32, (win, wc), 0)
    out_c = lax.broadcasted_iota(jnp.int32, (win, wc), 1)

    t_mats = [
        jnp.broadcast_to(
            jnp.where(in_r * stride + kh == out_r + x1, 1.0, 0.0).astype(cdt)[None],
            (bc, hc, hin))
        for kh in range(kernel_size)
    ]
    s_mats = [
        jnp.broadcast_to(
            jnp.where(in_c * stride + kw == out_c + y1, 1.0, 0.0).astype(cdt)[None],
            (bc, win, wc))
        for kw in range(kernel_size)
    ]

    acc = jnp.zeros((bc, hc, wc), jnp.float32)
    for kh in range(kernel_size):
        row_acc = jnp.zeros((bc, hin, wc), jnp.float32)
        for kw in range(kernel_size):
            # Flat target index this window offset would scatter to.
            target = (hi * stride + kh) * wout + (wi * stride + kw)   # (Hin, Win)
            plane = jnp.where(idx == target, vals, 0)                 # (bc, Hin, Win)
            # Column scatter: (bc, Hin, Win) @ (bc, Win, Wc) -> (bc, Hin, Wc)
            row_acc = row_acc + jnp.einsum(
                'bhw,bwq->bhq', plane, s_mats[kw],
                preferred_element_type=jnp.float32)
        # Row scatter: (bc, Hc, Hin) @ (bc, Hin, Wc) -> (bc, Hc, Wc)
        acc = acc + jnp.einsum(
            'bph,bhq->bpq', t_mats[kh], row_acc.astype(cdt),
            preferred_element_type=jnp.float32)

    o_ref[0] = acc.astype(o_ref.dtype)


def crop_max_unpool2d(f_maps, indices, kernel_size, stride, padding=None,
                      *, channel_block=None):
    """Forward pass of CropMaxUnpool2d: MaxUnpool2d(kernel_size, stride) + crop."""
    N, C, Hin, Win = f_maps.shape
    Hout = (Hin - 1) * stride + kernel_size
    Wout = (Win - 1) * stride + kernel_size

    if padding is None:
        x1, y1 = 0, 0
    else:
        x1, y1 = int(padding[2]), int(padding[0])
    Hc, Wc = Hout - x1, Wout - y1

    idx = indices if indices.dtype == jnp.int32 else indices.astype(jnp.int32)

    # All channels of one image per grid step by default (big blocks, tiny grid).
    bc = C if channel_block is None else max(1, min(channel_block, C))
    grid = (N, pl.cdiv(C, bc))

    kernel = functools.partial(
        _unpool_kernel,
        kernel_size=kernel_size, stride=stride,
        wout=Wout, x1=x1, y1=y1, hc=Hc, wc=Wc,
    )

    return pl.pallas_call(
        kernel,
        out_shape=jax.ShapeDtypeStruct((N, C, Hc, Wc), f_maps.dtype),
        grid=grid,
        in_specs=[
            pl.BlockSpec((1, bc, Hin, Win), lambda n, c: (n, c, 0, 0)),
            pl.BlockSpec((1, bc, Hin, Win), lambda n, c: (n, c, 0, 0)),
        ],
        out_specs=pl.BlockSpec((1, bc, Hc, Wc), lambda n, c: (n, c, 0, 0)),
        compiler_params=pltpu.CompilerParams(
            dimension_semantics=("parallel", "parallel")),
    )(idx, f_maps)


def _reference(f_maps, indices, kernel_size, stride, padding=None):
    """Pure-JAX reference: scatter unpool + crop (matches nn.MaxUnpool2d)."""
    N, C, Hin, Win = f_maps.shape
    Hout = (Hin - 1) * stride + kernel_size
    Wout = (Win - 1) * stride + kernel_size
    flat = jnp.zeros((N, C, Hout * Wout), f_maps.dtype)
    n_i = jnp.arange(N)[:, None, None]
    c_i = jnp.arange(C)[None, :, None]
    flat = flat.at[n_i, c_i, indices.reshape(N, C, -1)].set(f_maps.reshape(N, C, -1))
    out = flat.reshape(N, C, Hout, Wout)
    if padding is not None:
        out = out[:, :, padding[2]:, padding[0]:]
    return out


if __name__ == "__main__":
    # Module hyperparameters (CropMaxUnpool2d has no learnable weights).
    kernel_size, stride = 2, 2

    # Pooled feature maps + indices as produced by the matching PadMaxPool2d:
    # original 15x15 map was padded to 16x16 and pooled to 8x8; the pad amounts
    # (left=1, right=0, top=1, bottom=0) are handed back here to crop.
    N, C, Hin, Win = 2, 4, 8, 8
    Hout = (Hin - 1) * stride + kernel_size      # 16
    Wout = (Win - 1) * stride + kernel_size      # 16
    padding = [1, 0, 1, 0]                       # -> output cropped to 15x15

    key = jax.random.PRNGKey(0)
    kv, kh_key, kw_key = jax.random.split(key, 3)
    f_maps = jax.random.normal(kv, (N, C, Hin, Win), dtype=jnp.float32)
    # Valid max-pool argmax indices: one position per (non-overlapping) window.
    kh_sel = jax.random.randint(kh_key, (N, C, Hin, Win), 0, kernel_size)
    kw_sel = jax.random.randint(kw_key, (N, C, Hin, Win), 0, kernel_size)
    row = jnp.arange(Hin).reshape(1, 1, Hin, 1) * stride + kh_sel
    col = jnp.arange(Win).reshape(1, 1, 1, Win) * stride + kw_sel
    indices = (row * Wout + col).astype(jnp.int32)

    out = crop_max_unpool2d(f_maps, indices, kernel_size, stride, padding)
    out = jax.block_until_ready(out)

    ref = _reference(f_maps, indices, kernel_size, stride, padding)
    assert out.shape == ref.shape == (N, C, 15, 15), (out.shape, ref.shape)
    assert jnp.allclose(out, ref, atol=1e-5, rtol=1e-5), "mismatch vs reference"

    print("KERNEL_OK")
</pallas_src>

<mosaic_0001>
module attributes {stable_mosaic.version = 11 : i64} {
  func.func @_unpool_kernel(%arg0: i32, %arg1: i32, %arg2: memref<1x4x8x8xi32, #tpu.memory_space<vmem>>, %arg3: memref<1x4x8x8xf32, #tpu.memory_space<vmem>>, %arg4: memref<1x4x15x15xf32, #tpu.memory_space<vmem>>) attributes {dimension_semantics = [#tpu.dimension_semantics<parallel>, #tpu.dimension_semantics<parallel>], iteration_bounds = array<i64: 2, 1>, scalar_prefetch = 0 : i64, scratch_operands = 0 : i64, tpu.core_type = #tpu.core_type<tc>, window_params = [{transform_indices = @transform_0, window_bounds = array<i64: 1, 4, 8, 8>}, {transform_indices = @transform_1, window_bounds = array<i64: 1, 4, 8, 8>}, {transform_indices = @transform_2, window_bounds = array<i64: 1, 4, 15, 15>}]} {
    %c0 = arith.constant 0 : index
    %c0_0 = arith.constant 0 : index
    %c0_1 = arith.constant 0 : index
    %c0_2 = arith.constant 0 : index
    %0 = vector.load %arg2[%c0, %c0_0, %c0_1, %c0_2] : memref<1x4x8x8xi32, #tpu.memory_space<vmem>>, vector<1x4x8x8xi32>
    %1 = vector.shape_cast %0 : vector<1x4x8x8xi32> to vector<4x8x8xi32>
    %c0_3 = arith.constant 0 : index
    %c0_4 = arith.constant 0 : index
    %c0_5 = arith.constant 0 : index
    %c0_6 = arith.constant 0 : index
    %2 = vector.load %arg3[%c0_3, %c0_4, %c0_5, %c0_6] : memref<1x4x8x8xf32, #tpu.memory_space<vmem>>, vector<1x4x8x8xf32>
    %3 = vector.shape_cast %2 : vector<1x4x8x8xf32> to vector<4x8x8xf32>
    %4 = tpu.iota {dimensions = array<i32: 0>} : vector<8x8xi32>
    %5 = tpu.iota {dimensions = array<i32: 1>} : vector<8x8xi32>
    %6 = tpu.iota {dimensions = array<i32: 0>} : vector<15x8xi32>
    %7 = tpu.iota {dimensions = array<i32: 1>} : vector<15x8xi32>
    %8 = tpu.iota {dimensions = array<i32: 0>} : vector<8x15xi32>
    %9 = tpu.iota {dimensions = array<i32: 1>} : vector<8x15xi32>
    %c2_i32 = arith.constant 2 : i32
    %10 = vector.broadcast %c2_i32 : i32 to vector<15x8xi32>
    %11 = arith.muli %7, %10 : vector<15x8xi32>
    %c0_i32 = arith.constant 0 : i32
    %12 = vector.broadcast %c0_i32 : i32 to vector<15x8xi32>
    %13 = arith.addi %11, %12 : vector<15x8xi32>
    %c1_i32 = arith.constant 1 : i32
    %14 = vector.broadcast %c1_i32 : i32 to vector<15x8xi32>
    %15 = arith.addi %6, %14 : vector<15x8xi32>
    %16 = arith.cmpi eq, %13, %15 : vector<15x8xi32>
    %cst = arith.constant 1.000000e+00 : f32
    %cst_7 = arith.constant 0.000000e+00 : f32
    %17 = vector.broadcast %cst : f32 to vector<15x8xf32>
    %18 = vector.broadcast %cst_7 : f32 to vector<15x8xf32>
    %19 = arith.select %16, %17, %18 : vector<15x8xi1>, vector<15x8xf32>
    %20 = vector.shape_cast %19 : vector<15x8xf32> to vector<1x15x8xf32>
    %21 = vector.shape_cast %20 : vector<1x15x8xf32> to vector<1x15x8xf32>
    %22 = vector.broadcast %21 : vector<1x15x8xf32> to vector<4x15x8xf32>
    %c2_i32_8 = arith.constant 2 : i32
    %23 = vector.broadcast %c2_i32_8 : i32 to vector<15x8xi32>
    %24 = arith.muli %7, %23 : vector<15x8xi32>
    %c1_i32_9 = arith.constant 1 : i32
    %25 = vector.broadcast %c1_i32_9 : i32 to vector<15x8xi32>
    %26 = arith.addi %24, %25 : vector<15x8xi32>
    %c1_i32_10 = arith.constant 1 : i32
    %27 = vector.broadcast %c1_i32_10 : i32 to vector<15x8xi32>
    %28 = arith.addi %6, %27 : vector<15x8xi32>
    %29 = arith.cmpi eq, %26, %28 : vector<15x8xi32>
    %cst_11 = arith.constant 1.000000e+00 : f32
    %cst_12 = arith.constant 0.000000e+00 : f32
    %30 = vector.broadcast %cst_11 : f32 to vector<15x8xf32>
    %31 = vector.broadcast %cst_12 : f32 to vector<15x8xf32>
    %32 = arith.select %29, %30, %31 : vector<15x8xi1>, vector<15x8xf32>
    %33 = vector.shape_cast %32 : vector<15x8xf32> to vector<1x15x8xf32>
    %34 = vector.shape_cast %33 : vector<1x15x8xf32> to vector<1x15x8xf32>
    %35 = vector.broadcast %34 : vector<1x15x8xf32> to vector<4x15x8xf32>
    %c2_i32_13 = arith.constant 2 : i32
    %36 = vector.broadcast %c2_i32_13 : i32 to vector<8x15xi32>
    %37 = arith.muli %8, %36 : vector<8x15xi32>
    %c0_i32_14 = arith.constant 0 : i32
    %38 = vector.broadcast %c0_i32_14 : i32 to vector<8x15xi32>
    %39 = arith.addi %37, %38 : vector<8x15xi32>
    %c1_i32_15 = arith.constant 1 : i32
    %40 = vector.broadcast %c1_i32_15 : i32 to vector<8x15xi32>
    %41 = arith.addi %9, %40 : vector<8x15xi32>
    %42 = arith.cmpi eq, %39, %41 : vector<8x15xi32>
    %cst_16 = arith.constant 1.000000e+00 : f32
    %cst_17 = arith.constant 0.000000e+00 : f32
    %43 = vector.broadcast %cst_16 : f32 to vector<8x15xf32>
    %44 = vector.broadcast %cst_17 : f32 to vector<8x15xf32>
    %45 = arith.select %42, %43, %44 : vector<8x15xi1>, vector<8x15xf32>
    %46 = vector.shape_cast %45 : vector<8x15xf32> to vector<1x8x15xf32>
    %47 = vector.shape_cast %46 : vector<1x8x15xf32> to vector<1x8x15xf32>
    %48 = vector.broadcast %47 : vector<1x8x15xf32> to vector<4x8x15xf32>
    %c2_i32_18 = arith.constant 2 : i32
    %49 = vector.broadcast %c2_i32_18 : i32 to vector<8x15xi32>
    %50 = arith.muli %8, %49 : vector<8x15xi32>
    %c1_i32_19 = arith.constant 1 : i32
    %51 = vector.broadcast %c1_i32_19 : i32 to vector<8x15xi32>
    %52 = arith.addi %50, %51 : vector<8x15xi32>
    %c1_i32_20 = arith.constant 1 : i32
    %53 = vector.broadcast %c1_i32_20 : i32 to vector<8x15xi32>
    %54 = arith.addi %9, %53 : vector<8x15xi32>
    %55 = arith.cmpi eq, %52, %54 : vector<8x15xi32>
    %cst_21 = arith.constant 1.000000e+00 : f32
    %cst_22 = arith.constant 0.000000e+00 : f32
    %56 = vector.broadcast %cst_21 : f32 to vector<8x15xf32>
    %57 = vector.broadcast %cst_22 : f32 to vector<8x15xf32>
    %58 = arith.select %55, %56, %57 : vector<8x15xi1>, vector<8x15xf32>
    %59 = vector.shape_cast %58 : vector<8x15xf32> to vector<1x8x15xf32>
    %60 = vector.shape_cast %59 : vector<1x8x15xf32> to vector<1x8x15xf32>
    %61 = vector.broadcast %60 : vector<1x8x15xf32> to vector<4x8x15xf32>
    %cst_23 = arith.constant 0.000000e+00 : f32
    %62 = vector.broadcast %cst_23 : f32 to vector<4x15x15xf32>
    %cst_24 = arith.constant 0.000000e+00 : f32
    %63 = vector.broadcast %cst_24 : f32 to vector<4x8x15xf32>
    %c2_i32_25 = arith.constant 2 : i32
    %64 = vector.broadcast %c2_i32_25 : i32 to vector<8x8xi32>
    %65 = arith.muli %4, %64 : vector<8x8xi32>
    %c0_i32_26 = arith.constant 0 : i32
    %66 = vector.broadcast %c0_i32_26 : i32 to vector<8x8xi32>
    %67 = arith.addi %65, %66 : vector<8x8xi32>
    %c16_i32 = arith.constant 16 : i32
    %68 = vector.broadcast %c16_i32 : i32 to vector<8x8xi32>
    %69 = arith.muli %67, %68 : vector<8x8xi32>
    %c2_i32_27 = arith.constant 2 : i32
    %70 = vector.broadcast %c2_i32_27 : i32 to vector<8x8xi32>
    %71 = arith.muli %5, %70 : vector<8x8xi32>
    %c0_i32_28 = arith.constant 0 : i32
    %72 = vector.broadcast %c0_i32_28 : i32 to vector<8x8xi32>
    %73 = arith.addi %71, %72 : vector<8x8xi32>
    %74 = arith.addi %69, %73 : vector<8x8xi32>
    %75 = vector.shape_cast %74 : vector<8x8xi32> to vector<1x8x8xi32>
    %76 = vector.broadcast %75 : vector<1x8x8xi32> to vector<4x8x8xi32>
    %77 = arith.cmpi eq, %1, %76 : vector<4x8x8xi32>
    %c0_i32_29 = arith.constant 0 : i32
    %78 = arith.sitofp %c0_i32_29 : i32 to f32
    %79 = vector.broadcast %78 : f32 to vector<4x8x8xf32>
    %80 = arith.select %77, %3, %79 : vector<4x8x8xi1>, vector<4x8x8xf32>
    "tpu.trace_start"() <{level = 10 : i32, message = "bhw,bwq->bhq"}> : () -> ()
    %cst_30 = arith.constant dense<0.000000e+00> : vector<4x8x15xf32>
    %81 = tpu.matmul %80, %48, %cst_30 {dimension_numbers = #tpu.dot_dimension_numbers<[2], [1], [1], [2], [0, 0, 0, 1, 1, 2], [0], [0]>} : vector<4x8x8xf32>, vector<4x8x15xf32>, vector<4x8x15xf32> -> vector<4x8x15xf32>
    "tpu.trace_stop"() : () -> ()
    %82 = arith.addf %63, %81 : vector<4x8x15xf32>
    %c2_i32_31 = arith.constant 2 : i32
    %83 = vector.broadcast %c2_i32_31 : i32 to vector<8x8xi32>
    %84 = arith.muli %4, %83 : vector<8x8xi32>
    %c0_i32_32 = arith.constant 0 : i32
    %85 = vector.broadcast %c0_i32_32 : i32 to vector<8x8xi32>
    %86 = arith.addi %84, %85 : vector<8x8xi32>
    %c16_i32_33 = arith.constant 16 : i32
    %87 = vector.broadcast %c16_i32_33 : i32 to vector<8x8xi32>
    %88 = arith.muli %86, %87 : vector<8x8xi32>
    %c2_i32_34 = arith.constant 2 : i32
    %89 = vector.broadcast %c2_i32_34 : i32 to vector<8x8xi32>
    %90 = arith.muli %5, %89 : vector<8x8xi32>
    %c1_i32_35 = arith.constant 1 : i32
    %91 = vector.broadcast %c1_i32_35 : i32 to vector<8x8xi32>
    %92 = arith.addi %90, %91 : vector<8x8xi32>
    %93 = arith.addi %88, %92 : vector<8x8xi32>
    %94 = vector.shape_cast %93 : vector<8x8xi32> to vector<1x8x8xi32>
    %95 = vector.broadcast %94 : vector<1x8x8xi32> to vector<4x8x8xi32>
    %96 = arith.cmpi eq, %1, %95 : vector<4x8x8xi32>
    %c0_i32_36 = arith.constant 0 : i32
    %97 = arith.sitofp %c0_i32_36 : i32 to f32
    %98 = vector.broadcast %97 : f32 to vector<4x8x8xf32>
    %99 = arith.select %96, %3, %98 : vector<4x8x8xi1>, vector<4x8x8xf32>
    "tpu.trace_start"() <{level = 10 : i32, message = "bhw,bwq->bhq"}> : () -> ()
    %cst_37 = arith.constant dense<0.000000e+00> : vector<4x8x15xf32>
    %100 = tpu.matmul %99, %61, %cst_37 {dimension_numbers = #tpu.dot_dimension_numbers<[2], [1], [1], [2], [0, 0, 0, 1, 1, 2], [0], [0]>} : vector<4x8x8xf32>, vector<4x8x15xf32>, vector<4x8x15xf32> -> vector<4x8x15xf32>
    "tpu.trace_stop"() : () -> ()
    %101 = arith.addf %82, %100 : vector<4x8x15xf32>
    "tpu.trace_start"() <{level = 10 : i32, message = "bph,bhq->bpq"}> : () -> ()
    %cst_38 = arith.constant dense<0.000000e+00> : vector<4x15x15xf32>
    %102 = tpu.matmul %22, %101, %cst_38 {dimension_numbers = #tpu.dot_dimension_numbers<[2], [1], [1], [2], [0, 0, 0, 1, 1, 2], [0], [0]>} : vector<4x15x8xf32>, vector<4x8x15xf32>, vector<4x15x15xf32> -> vector<4x15x15xf32>
    "tpu.trace_stop"() : () -> ()
    %103 = arith.addf %62, %102 : vector<4x15x15xf32>
    %cst_39 = arith.constant 0.000000e+00 : f32
    %104 = vector.broadcast %cst_39 : f32 to vector<4x8x15xf32>
    %c2_i32_40 = arith.constant 2 : i32
    %105 = vector.broadcast %c2_i32_40 : i32 to vector<8x8xi32>
    %106 = arith.muli %4, %105 : vector<8x8xi32>
    %c1_i32_41 = arith.constant 1 : i32
    %107 = vector.broadcast %c1_i32_41 : i32 to vector<8x8xi32>
    %108 = arith.addi %106, %107 : vector<8x8xi32>
    %c16_i32_42 = arith.constant 16 : i32
    %109 = vector.broadcast %c16_i32_42 : i32 to vector<8x8xi32>
    %110 = arith.muli %108, %109 : vector<8x8xi32>
    %c2_i32_43 = arith.constant 2 : i32
    %111 = vector.broadcast %c2_i32_43 : i32 to vector<8x8xi32>
    %112 = arith.muli %5, %111 : vector<8x8xi32>
    %c0_i32_44 = arith.constant 0 : i32
    %113 = vector.broadcast %c0_i32_44 : i32 to vector<8x8xi32>
    %114 = arith.addi %112, %113 : vector<8x8xi32>
    %115 = arith.addi %110, %114 : vector<8x8xi32>
    %116 = vector.shape_cast %115 : vector<8x8xi32> to vector<1x8x8xi32>
    %117 = vector.broadcast %116 : vector<1x8x8xi32> to vector<4x8x8xi32>
    %118 = arith.cmpi eq, %1, %117 : vector<4x8x8xi32>
    %c0_i32_45 = arith.constant 0 : i32
    %119 = arith.sitofp %c0_i32_45 : i32 to f32
    %120 = vector.broadcast %119 : f32 to vector<4x8x8xf32>
    %121 = arith.select %118, %3, %120 : vector<4x8x8xi1>, vector<4x8x8xf32>
    "tpu.trace_start"() <{level = 10 : i32, message = "bhw,bwq->bhq"}> : () -> ()
    %cst_46 = arith.constant dense<0.000000e+00> : vector<4x8x15xf32>
    %122 = tpu.matmul %121, %48, %cst_46 {dimension_numbers = #tpu.dot_dimension_numbers<[2], [1], [1], [2], [0, 0, 0, 1, 1, 2], [0], [0]>} : vector<4x8x8xf32>, vector<4x8x15xf32>, vector<4x8x15xf32> -> vector<4x8x15xf32>
    "tpu.trace_stop"() : () -> ()
    %123 = arith.addf %104, %122 : vector<4x8x15xf32>
    %c2_i32_47 = arith.constant 2 : i32
    %124 = vector.broadcast %c2_i32_47 : i32 to vector<8x8xi32>
    %125 = arith.muli %4, %124 : vector<8x8xi32>
    %c1_i32_48 = arith.constant 1 : i32
    %126 = vector.broadcast %c1_i32_48 : i32 to vector<8x8xi32>
    %127 = arith.addi %125, %126 : vector<8x8xi32>
    %c16_i32_49 = arith.constant 16 : i32
    %128 = vector.broadcast %c16_i32_49 : i32 to vector<8x8xi32>
    %129 = arith.muli %127, %128 : vector<8x8xi32>
    %c2_i32_50 = arith.constant 2 : i32
    %130 = vector.broadcast %c2_i32_50 : i32 to vector<8x8xi32>
    %131 = arith.muli %5, %130 : vector<8x8xi32>
    %c1_i32_51 = arith.constant 1 : i32
    %132 = vector.broadcast %c1_i32_51 : i32 to vector<8x8xi32>
    %133 = arith.addi %131, %132 : vector<8x8xi32>
    %134 = arith.addi %129, %133 : vector<8x8xi32>
    %135 = vector.shape_cast %134 : vector<8x8xi32> to vector<1x8x8xi32>
    %136 = vector.broadcast %135 : vector<1x8x8xi32> to vector<4x8x8xi32>
    %137 = arith.cmpi eq, %1, %136 : vector<4x8x8xi32>
    %c0_i32_52 = arith.constant 0 : i32
    %138 = arith.sitofp %c0_i32_52 : i32 to f32
    %139 = vector.broadcast %138 : f32 to vector<4x8x8xf32>
    %140 = arith.select %137, %3, %139 : vector<4x8x8xi1>, vector<4x8x8xf32>
    "tpu.trace_start"() <{level = 10 : i32, message = "bhw,bwq->bhq"}> : () -> ()
    %cst_53 = arith.constant dense<0.000000e+00> : vector<4x8x15xf32>
    %141 = tpu.matmul %140, %61, %cst_53 {dimension_numbers = #tpu.dot_dimension_numbers<[2], [1], [1], [2], [0, 0, 0, 1, 1, 2], [0], [0]>} : vector<4x8x8xf32>, vector<4x8x15xf32>, vector<4x8x15xf32> -> vector<4x8x15xf32>
    "tpu.trace_stop"() : () -> ()
    %142 = arith.addf %123, %141 : vector<4x8x15xf32>
    "tpu.trace_start"() <{level = 10 : i32, message = "bph,bhq->bpq"}> : () -> ()
    %cst_54 = arith.constant dense<0.000000e+00> : vector<4x15x15xf32>
    %143 = tpu.matmul %35, %142, %cst_54 {dimension_numbers = #tpu.dot_dimension_numbers<[2], [1], [1], [2], [0, 0, 0, 1, 1, 2], [0], [0]>} : vector<4x15x8xf32>, vector<4x8x15xf32>, vector<4x15x15xf32> -> vector<4x15x15xf32>
    "tpu.trace_stop"() : () -> ()
    %144 = arith.addf %103, %143 : vector<4x15x15xf32>
    %c0_55 = arith.constant 0 : index
    %c0_56 = arith.constant 0 : index
    %c0_57 = arith.constant 0 : index
    %c0_58 = arith.constant 0 : index
    %145 = vector.load %arg4[%c0_55, %c0_56, %c0_57, %c0_58] : memref<1x4x15x15xf32, #tpu.memory_space<vmem>>, vector<1x4x15x15xf32>
    %146 = vector.shape_cast %145 : vector<1x4x15x15xf32> to vector<4x15x15xf32>
    %147 = vector.shape_cast %144 : vector<4x15x15xf32> to vector<1x4x15x15xf32>
    tpu.vector_store %arg4[%c0_55, %c0_56, %c0_57, %c0_58], %147 {strides = array<i32>} : memref<1x4x15x15xf32, #tpu.memory_space<vmem>>, vector<1x4x15x15xf32>,
    return
  }
  func.func @transform_0(%arg0: i32, %arg1: i32) -> (i32, i32, i32, i32) {
    %c0_i32 = arith.constant 0 : i32
    %c0_i32_0 = arith.constant 0 : i32
    %c0_i32_1 = arith.constant 0 : i32
    return %arg0, %arg1, %c0_i32, %c0_i32_0 : i32, i32, i32, i32
  }
  func.func @transform_1(%arg0: i32, %arg1: i32) -> (i32, i32, i32, i32) {
    %c0_i32 = arith.constant 0 : i32
    %c0_i32_0 = arith.constant 0 : i32
    %c0_i32_1 = arith.constant 0 : i32
    return %arg0, %arg1, %c0_i32, %c0_i32_0 : i32, i32, i32, i32
  }
  func.func @transform_2(%arg0: i32, %arg1: i32) -> (i32, i32, i32, i32) {
    %c0_i32 = arith.constant 0 : i32
    %c0_i32_0 = arith.constant 0 : i32
    %c0_i32_1 = arith.constant 0 : i32
    return %arg0, %arg1, %c0_i32, %c0_i32_0 : i32, i32, i32, i32
  }
}

</mosaic_0001>

<bundles_post_ra>
// kernel: tpu_custom_call.1
= control target key start
LH: loop header
LB: loop body
LE: loop exit
PB: predicated region body
PF: predicated region fallthrough
CT: control target
= control target key end

     0   :  { %7 = vsyncpa [#allocation3], 0  ;;  %s3108_s0 = inlined_call_operand.hbm [shape: s32[2,4,8,8], index: 0, kind: input, shape index: {}]   ;;  %s3109_s1 = inlined_call_operand.hbm [shape: f32[2,4,8,8], index: 1, kind: input, shape index: {}]   ;;  %s3110_s2 = inlined_call_operand.vmem [shape: f32[2,4,15,15], index: 2, kind: output, shape index: {}]  }
   0x1   :  { %9 = vsyncpa [#allocation3 + $0x1], 0 }
   0x2   :  { %10 = vsyncpa [#allocation5], 0 }
   0x3   :  { %12 = vsyncpa [#allocation5 + $0x1], 0  ;;  %s2698_s9 = smov 0   ;;  %s2700_s10 = smov 0  }
   0x4   :  { %s2702_s11 = smov 0   ;;  %s2704_s12 = smov 0  }
   0x5   :  { %s2706_s13 = smov 0   ;;  %s2708_s14 = smov 0  }
   0x6 LB: > { %s2227_s15 = sadd.s32 4294967295, %s2674_s14   ;;  %s30_s16 = sadd.s32 1, %s2670_s13  ;;  %s2674_s14 = sphi %s2708_s14, %s18_s14   ;;  %s2670_s13 = sphi %s2706_s13, %s3125_s13   ;;  %s2666_s12 = sphi %s2704_s12, %s3124_s12   ;;  %s2662_s11 = sphi %s2702_s11, %s3123_s11   ;;  %s2658_s10 = sphi %s2700_s10, %s3122_s10   ;;  %s2654_s9 = sphi %s2698_s9, %s3121_s9  }
   0x7   : > { %p32_p0 = scmp.ge.s32.totalorder %s30_s16, 2  ;;  %s39_s17 = sadd.s32 1, %s2662_s11 }
   0x8   : > { %p46_p1 = scmp.ne.s32.totalorder %s2662_s11, %s2658_s10  ;;  %p47_p2 = scmp.eq.s32.totalorder %s2674_s14, 0 }
   0x9   : > { %s3127_s16 = smov (%p32_p0, %s30_s16), 0  ;;  %p52_p4 = scmp.ne.s32.totalorder %s2658_s10, %s2654_s9 }
   0xa   : > { %p2734_p3 = por %p47_p2, %p46_p1  ;;  %s34_s19 = ssub.s32 %s2670_s13, %s3127_s16 }
   0xb   : > { %p53_p5 = scmp.eq.s32.totalorder %s2227_s15, 0  ;;  %p37_p6 = scmp.eq.s32.totalorder %s34_s19, 0 }
   0xc   : > { %p2506_p8 = scmp.lt.s32.totalorder %s2674_s14, 2  ;;  %s2750_s22 = sand.u32 1, %s2662_s11  }
   0xd   : > { %p2741_p7 = por %p53_p5, %p52_p4  ;;  %s2292_s23 = sshll.u32 %s2670_s13, 9 }
   0xe   : > { %s2747_s21 = scalar_select %p37_p6, %s2662_s11, %s39_s17  }
   0xf   : > { %s3113_s20 = scalar_select %p2741_p7, 1, 0 }
  0x10   : > { %s2231_s24 = sshll.u32 %s2750_s22, 5  ;;  %s2759_s27 = scalar_lea.hbm %s3108_s0, %s2292_s23 }
  0x11   : > { %s136_s28 = scalar_lea.vmem [#allocation2], %s2231_s24  ;;  %p2765_p9 = pnand %p2506_p8, %p2734_p3 }
  0x12   : > { %s145_s29 = sshll.u32 %s136_s28, 4  ;;  %s133_s3 = scalar_lea.sflag [#allocation3], %s2750_s22  ;;  %s2769_s29 = int_to_ptr.vmem [resolvable:$true] %s145_s29 }
  0x13   : > { %s2560_s4 = scalar_lea.hbm %s2759_s27, 512  ;;  %p2562_p11 = pneg %p2765_p9 }
  0x14   : > { %p2561_p10 = scmp.ne.s32.totalorder %s2759_s27, %s2560_s4  ;;  %s2565_s7 = scalar_lea.hbm %s3108_s0, 1024 }
  0x15   : > { %p2566_p0 = scmp.lt.u32.totalorder %s2759_s27, %s3108_s0  ;;  %p2567_p1 = scmp.lt.u32.totalorder %s2565_s7, %s2560_s4 }
  0x16   : > { %p2563_p12 = pnand %p2562_p11, %p2561_p10  ;;  %p2569_p3 = scmp.lt.u32.totalorder %s2560_s4, %s2759_s27 }
  0x17   : > { %p2568_p2 = por %p2567_p1, %p2566_p0 }
  0x18   : > { %p2564_p13 = pneg %p2563_p12 }
  0x19   : > { %p2570_p4 = por %p2569_p3, %p2568_p2 }
  0x1b   : > { %p2571_p5 = pnand %p2570_p4, %p2564_p13 }
  0x1d   : > { %2574 = shalt.err (!%p2571_p5)
}
  0x1e   : > { %s2575_s15 = scalar_lea.vmem %s2769_s29, 512  ;;  %s2676_s17 = smov [#allocation2]  }
  0x1f   : > { %p2576_p6 = scmp.ne.s32.totalorder %s2769_s29, %s2575_s15  ;;  %s2580_s18 = sshll.u32 %s2676_s17, 4  ;;  %s2581_s18 = int_to_ptr.vmem [resolvable:$false] %s2580_s18 }
  0x20   : > { %s2582_s19 = scalar_lea.vmem %s2581_s18, 1024  ;;  %p2583_p12 = scmp.lt.s32.totalorder %s2769_s29, %s2581_s18 }
  0x21   : > { %p2578_p8 = pnand %p2576_p6, %p2562_p11  ;;  %p2584_p0 = scmp.lt.s32.totalorder %s2582_s19, %s2575_s15 }
  0x23   : > { %p2579_p10 = pneg %p2578_p8  ;;  %p2585_p1 = por %p2584_p0, %p2583_p12 }
  0x25   : > { %p2586_p2 = pnand %p2585_p1, %p2579_p10 }
  0x27   : > { %2589 = shalt.err (!%p2586_p2)
}
  0x28   : > { %s2677_s25 = smov 128   ;;  %s2678_s26 = smov 8  }
  0x29   : > { %2502 = dma.hbm_to_vmem [thread:$0]  (!%p2765_p9), %s2759_s27, 512, %s2769_s29, %s133_s3, %s2677_s25, %s2677_s25, %s2678_s26  }
  0x2a   : > { %p2237_p13 = scmp.ge.s32.totalorder %s2674_s14, 1  ;;  %p176_p3 = scmp.lt.s32.totalorder %s2674_s14, 3 }
  0x2b   : > { %s2813_s6 = scalar_lea.hbm %s3109_s1, %s2292_s23  ;;  %s159_s7 = scalar_lea.vmem [#allocation4], %s2231_s24 }
  0x2c   : > { %p2804_p4 = pnand %p2237_p13, %p176_p3  ;;  %s168_s8 = sshll.u32 %s159_s7, 4  ;;  %s2817_s8 = int_to_ptr.vmem [resolvable:$true] %s168_s8 }
  0x2d   : > { %s156_s27 = scalar_lea.sflag [#allocation5], %s2750_s22  ;;  %s2590_s29 = scalar_lea.hbm %s2813_s6, 512 }
  0x2e   : > { %p2591_p5 = scmp.ne.s32.totalorder %s2813_s6, %s2590_s29  ;;  %s2595_s23 = scalar_lea.hbm %s3109_s1, 1024 }
  0x2f   : > { %p2596_p10 = scmp.lt.u32.totalorder %s2813_s6, %s3109_s1  ;;  %p2597_p12 = scmp.lt.u32.totalorder %s2595_s23, %s2590_s29 }
  0x30   : > { %p2593_p6 = pnand %p2591_p5, %p2562_p11  ;;  %p2599_p1 = scmp.lt.u32.totalorder %s2590_s29, %s2813_s6 }
  0x31   : > { %p2598_p0 = por %p2597_p12, %p2596_p10 }
  0x32   : > { %p2594_p8 = pneg %p2593_p6 }
  0x33   : > { %p2600_p2 = por %p2599_p1, %p2598_p0 }
  0x35   : > { %p2601_p13 = pnand %p2600_p2, %p2594_p8 }
  0x37   : > { %2604 = shalt.err (!%p2601_p13)
}
  0x38   : > { %s2605_s24 = scalar_lea.vmem %s2817_s8, 512  ;;  %s2679_s18 = smov [#allocation4]  }
  0x39   : > { %p2606_p3 = scmp.ne.s32.totalorder %s2817_s8, %s2605_s24  ;;  %s2610_s19 = sshll.u32 %s2679_s18, 4  ;;  %s2611_s19 = int_to_ptr.vmem [resolvable:$false] %s2610_s19 }
  0x3a   : > { %s2612_s4 = scalar_lea.vmem %s2611_s19, 1024  ;;  %p2613_p7 = scmp.lt.s32.totalorder %s2817_s8, %s2611_s19 }
  0x3b   : > { %p2608_p5 = pnand %p2606_p3, %p2562_p11  ;;  %p2614_p10 = scmp.lt.s32.totalorder %s2612_s4, %s2605_s24 }
  0x3d   : > { %p2609_p6 = pneg %p2608_p5  ;;  %p2615_p12 = por %p2614_p10, %p2613_p7 }
  0x3f   : > { %p2616_p0 = pnand %p2615_p12, %p2609_p6 }
  0x41   : > { %2619 = shalt.err (!%p2616_p0)
}
  0x42   : > { %2505 = dma.hbm_to_vmem [thread:$0]  (!%p2765_p9), %s2813_s6, 512, %s2817_s8, %s156_s27, %s2677_s25, %s2677_s25, %s2678_s26  }
  0x43   : > { %180 = sbr.rel (%p2804_p4) target bundleno = 554 (0x22a), region = 28  ;;  %s182_s5 = sand.u32 (!%p2804_p4), 1, %s2658_s10  }
  0x44   : > { %s2238_s7 = sshll.u32 (!%p2804_p4), %s182_s5, 5  ;;  %s183_s29 = scalar_lea.sflag (!%p2804_p4), [#allocation3], %s182_s5 }
  0x45   : > { %s2851_s3 = scalar_lea.vmem (!%p2804_p4), [#allocation2], %s2238_s7  ;;  %p3116_p7 = scmp.ne.s32.totalorder (!%p2804_p4), %s3113_s20, 0 }
  0x4a   : > { %2645 = dma.done.wait (%p3116_p7), %s183_s29, 512  }
  0x4b   : > { %2647 = vsyncadd (%p3116_p7), %s183_s29, 4294966784  ;;  %s192_s22 = scalar_lea.sflag [#allocation5], %s182_s5  ;;  %s2857_s30 = scalar_lea.vmem [#allocation4], %s2238_s7 }
  0x4c   : > { %2649 = dma.done.wait (%p3116_p7), %s192_s22, 512  }
  0x4d   : > { %2651 = vsyncadd (%p3116_p7), %s192_s22, 4294966784  ;;  %v247_v0 = vlaneseq  ;;  %v2680_v1 = vmov 0.0   ;;  %vm2681_vm0 = vmmov 0   ;;  %v2880_v10 = vld [vmem:[%s2851_s3] sm:$0xff]  ;;  %v2883_v11 = vld [vmem:[%s2851_s3 + $0x8] sm:$0xff]  ;;  %v2682_v17 = vmov 1.0  }
  0x4e   : > { %2351 = vmatprep.subr.mxu0 %v2680_v1  ;;  %2356 = vmatprep.subr.mxu1 %v2680_v1  ;;  %v2891_v13 = vld [vmem:[%s2857_s30] sm:$0xff]  ;;  %v2895_v15 = vld [vmem:[%s2857_s30 + $0x8] sm:$0xff]  ;;  %v2898_v16 = vld [vmem:[%s2851_s3 + $0x10] sm:$0xff]  ;;  %vm290_vm2 = vcmask 64512   ;;  %p229_p9 = scmp.lt.s32.totalorder %s2666_s12, 1 }
  0x4f   : > { %v2865_v2 = vshrl.u32 %v247_v0, 7  ;;  %v250_v3 = vand.u32 127, %v247_v0  ;;  %2353 = vmatprep.mubr.msk.f32.mxu0 %vm2681_vm0, %v2680_v1  ;;  %2358 = vmatprep.mubr.msk.f32.mxu1 %vm2681_vm0, %v2680_v1  ;;  %v2907_v18 = vld [vmem:[%s2851_s3 + $0x18] sm:$0xff]  ;;  %v2915_v20 = vld [vmem:[%s2857_s30 + $0x10] sm:$0xff] }
  0x50   : > { %v2919_v21 = vld [vmem:[%s2857_s30 + $0x18] sm:$0xff]  ;;  %s3129_s12 = smov (!%p229_p9, %s2666_s12), 1 }
  0x51   : > { %v2871_v4 = vmul.u32 2, %v250_v3  ;;  %v264_v5 = vmul.u32 2, %v2865_v2  ;;  %v265_v6 = vadd.s32 1, %v250_v3  ;;  %v253_v42 = vadd.s32 1, %v2865_v2  ;;  %s2294_s20 = sshll.u32 %s3129_s12, 6 }
  0x52   : > { %v251_v52 = vadd.s32 8, %v2865_v2  ;;  %s237_s28 = scalar_lea.vmem %s3110_s2, %s2294_s20 }
  0x53   : > { %v2874_v7 = vadd.s32 1, %v264_v5  ;;  %v2877_v8 = vadd.s32 1, %v2871_v4  ;;  %v271_v9 = vmul.u32 16, %v264_v5  ;;  %vm2938_vm7 = vcmp.eq.s32.totalorder %v264_v5, %v265_v6 }
  0x54   : > { %v254_v53 = vadd.s32 1, %v251_v52 }
  0x55   : > { %vm2886_vm1 = vcmp.eq.s32.totalorder %v2874_v7, %v265_v6  ;;  %v281_v14 = vadd.s32 %v271_v9, %v2877_v8  ;;  %v272_v19 = vadd.s32 %v271_v9, %v2871_v4  ;;  %v875_v27 = vmul.u32 16, %v2874_v7 }
  0x56   : > { %2352 = vmatpush3.msk.msra.mxu0 %vm2886_vm1, %v2682_v17  ;;  %2357 = vmatpush3.msk.msra.mxu1 %vm2886_vm1, %v2682_v17 }
  0x57   : > { %vm282_vm3 = vcmp.eq.s32.totalorder %v2880_v10, %v281_v14  ;;  %vm283_vm4 = vcmp.eq.s32.totalorder %v2883_v11, %v281_v14  ;;  %2361 = vmatprep.subr.mxu0 %v2680_v1  ;;  %2366 = vmatprep.subr.mxu1 %v2680_v1  ;;  %vm284_vm5 = vcmp.eq.s32.totalorder %v2898_v16, %v281_v14 }
  0x58   : > { %v286_v22 = vsel %vm282_vm3, %v2891_v13, 0.0  ;;  %v287_v23 = vsel %vm283_vm4, %v2895_v15, 0.0  ;;  %vm285_vm6 = vcmp.eq.s32.totalorder %v2907_v18, %v281_v14  ;;  %v288_v24 = vsel %vm284_vm5, %v2915_v20, 0.0 }
  0x59   : > { %2354 = vmatmul.mubr.msk.f32.vlgmr.msra.gmra.mrb[0].mxu0 %vm290_vm2, %v286_v22  ;;  %2359 = vmatmul.mubr.msk.f32.vlgmr.msra.gmra.mrb[0].mxu1 %vm290_vm2, %v287_v23  ;;  %v289_v25 = vsel %vm285_vm6, %v2919_v21, 0.0  ;;  %vm273_vm8 = vcmp.eq.s32.totalorder %v2880_v10, %v272_v19  ;;  %vm274_vm9 = vcmp.eq.s32.totalorder %v2883_v11, %v272_v19  ;;  %vm275_vm10 = vcmp.eq.s32.totalorder %v2898_v16, %v272_v19 }
  0x5a   : > { %2362 = vmatpush3.msk.msra.mxu0 %vm2886_vm1, %v2682_v17  ;;  %2363 = vmatprep.mubr.msk.f32.mxu0 %vm2681_vm0, %v2680_v1  ;;  %v277_v28 = vsel %vm273_vm8, %v2891_v13, 0.0  ;;  %v278_v29 = vsel %vm274_vm9, %v2895_v15, 0.0  ;;  %vm276_vm11 = vcmp.eq.s32.totalorder %v2907_v18, %v272_v19  ;;  %v885_v30 = vadd.s32 %v875_v27, %v2877_v8 }
  0x5b   : > { %2367 = vmatpush3.msk.msra.mxu1 %vm2886_vm1, %v2682_v17  ;;  %2368 = vmatprep.mubr.msk.f32.mxu1 %vm2681_vm0, %v2680_v1  ;;  %v279_v31 = vsel %vm275_vm10, %v2915_v20, 0.0  ;;  %v280_v32 = vsel %vm276_vm11, %v2919_v21, 0.0  ;;  %v876_v35 = vadd.s32 %v875_v27, %v2871_v4  ;;  %vm260_vm6 = vcmp.eq.s32.totalorder %v2877_v8, %v253_v42 }
  0x5c   : > { %2371 = vmatprep.subr.mxu0 %v2680_v1  ;;  %2376 = vmatprep.subr.mxu1 %v2680_v1  ;;  %vm886_vm12 = vcmp.eq.s32.totalorder %v2880_v10, %v885_v30  ;;  %vm887_vm13 = vcmp.eq.s32.totalorder %v2883_v11, %v885_v30  ;;  %vm888_vm14 = vcmp.eq.s32.totalorder %v2898_v16, %v885_v30  ;;  %v262_v43 = vsel %vm260_vm6, 1.0, %v2680_v1 }
  0x5d   : > { %2364 = vmatmul.mubr.msk.f32.vlgmr.msra.gmra.mrb[2].mxu0 %vm290_vm2, %v288_v24  ;;  %2369 = vmatmul.mubr.msk.f32.vlgmr.msra.gmra.mrb[2].mxu1 %vm290_vm2, %v289_v25  ;;  %v890_v33 = vsel %vm886_vm12, %v2891_v13, 0.0  ;;  %v891_v34 = vsel %vm887_vm13, %v2895_v15, 0.0  ;;  %vm889_vm15 = vcmp.eq.s32.totalorder %v2907_v18, %v885_v30  ;;  %v892_v36 = vsel %vm888_vm14, %v2915_v20, 0.0 }
  0x5e   : > { %2372 = vmatpush3.msk.msra.mxu0 %vm2938_vm7, %v2682_v17  ;;  %2373 = vmatprep.mubr.msk.f32.mxu0 %vm2681_vm0, %v2680_v1  ;;  %v893_v37 = vsel %vm889_vm15, %v2919_v21, 0.0  ;;  %vm877_vm3 = vcmp.eq.s32.totalorder %v2880_v10, %v876_v35  ;;  %vm878_vm4 = vcmp.eq.s32.totalorder %v2883_v11, %v876_v35  ;;  %vm880_vm5 = vcmp.eq.s32.totalorder %v2907_v18, %v876_v35 }
  0x5f   : > { %2377 = vmatpush3.msk.msra.mxu1 %vm2938_vm7, %v2682_v17  ;;  %2378 = vmatprep.mubr.msk.f32.mxu1 %vm2681_vm0, %v2680_v1  ;;  %v881_v38 = vsel %vm877_vm3, %v2891_v13, 0.0  ;;  %v882_v39 = vsel %vm878_vm4, %v2895_v15, 0.0  ;;  %v884_v41 = vsel %vm880_vm5, %v2919_v21, 0.0  ;;  %vm256_vm8 = vcmp.eq.s32.totalorder %v2871_v4, %v254_v53 }
  0x60   : > { %2381 = vmatprep.subr.mxu0 %v2680_v1  ;;  %2386 = vmatprep.subr.mxu1 %v2680_v1  ;;  %v258_v0 = vsel %vm256_vm8, 1.0, %v2680_v1  ;;  %vm2092_vm9 = vcmask 120832   ;;  %vm2090_vm10 = vcmask 121856  }
  0x61   : > { %2374 = vmatmul.mubr.msk.f32.vlgmr.msra.gmra.mrb[0].mxu0 %vm290_vm2, %v277_v28  ;;  %2379 = vmatmul.mubr.msk.f32.vlgmr.msra.gmra.mrb[0].mxu1 %vm290_vm2, %v278_v29 }
  0x62   : > { %2382 = vmatpush3.msk.msra.mxu0 %vm2938_vm7, %v2682_v17  ;;  %2383 = vmatprep.mubr.msk.f32.mxu0 %vm2681_vm0, %v2680_v1 }
  0x63   : > { %2387 = vmatpush3.msk.msra.mxu1 %vm2938_vm7, %v2682_v17  ;;  %2388 = vmatprep.mubr.msk.f32.mxu1 %vm2681_vm0, %v2680_v1 }
  0x64   : > { %2391 = vmatprep.subr.mxu0 %v2680_v1  ;;  %2396 = vmatprep.subr.mxu1 %v2680_v1 }
  0x65   : > { %2384 = vmatmul.mubr.msk.f32.vlgmr.msra.gmra.mrb[2].mxu0 %vm290_vm2, %v279_v31  ;;  %2389 = vmatmul.mubr.msk.f32.vlgmr.msra.gmra.mrb[2].mxu1 %vm290_vm2, %v280_v32 }
  0x66   : > { %2392 = vmatpush3.msk.msra.mxu0 %vm2886_vm1, %v2682_v17  ;;  %2393 = vmatprep.mubr.msk.f32.mxu0 %vm2681_vm0, %v2680_v1 }
  0x67   : > { %2397 = vmatpush3.msk.msra.mxu1 %vm2886_vm1, %v2682_v17  ;;  %2398 = vmatprep.mubr.msk.f32.mxu1 %vm2681_vm0, %v2680_v1 }
  0x68   : > { %2401 = vmatprep.subr.mxu0 %v2680_v1  ;;  %2406 = vmatprep.subr.mxu1 %v2680_v1 }
  0x69   : > { %2394 = vmatmul.mubr.msk.f32.vlgmr.msra.gmra.mrb[4].mxu0 %vm290_vm2, %v890_v33  ;;  %2399 = vmatmul.mubr.msk.f32.vlgmr.msra.gmra.mrb[4].mxu1 %vm290_vm2, %v891_v34 }
  0x6a   : > { %2402 = vmatpush3.msk.msra.mxu0 %vm2886_vm1, %v2682_v17  ;;  %2403 = vmatprep.mubr.msk.f32.mxu0 %vm2681_vm0, %v2680_v1 }
  0x6b   : > { %2407 = vmatpush3.msk.msra.mxu1 %vm2886_vm1, %v2682_v17  ;;  %2408 = vmatprep.mubr.msk.f32.mxu1 %vm2681_vm0, %v2680_v1  ;;  %vm879_vm1 = vcmp.eq.s32.totalorder %v2898_v16, %v876_v35 }
  0x6c   : > { %2411 = vmatprep.subr.mxu0 %v2680_v1  ;;  %2416 = vmatprep.subr.mxu1 %v2680_v1  ;;  %v883_v40 = vsel %vm879_vm1, %v2915_v20, 0.0 }
  0x6d   : > { %2404 = vmatmul.mubr.msk.f32.vlgmr.msra.gmra.mrb[6].mxu0 %vm290_vm2, %v892_v36  ;;  %2409 = vmatmul.mubr.msk.f32.vlgmr.msra.gmra.mrb[6].mxu1 %vm290_vm2, %v893_v37 }
  0x6e   : > { %2412 = vmatpush3.msk.msra.mxu0 %vm2938_vm7, %v2682_v17  ;;  %2413 = vmatprep.mubr.msk.f32.mxu0 %vm2681_vm0, %v2680_v1 }
  0x6f   : > { %2417 = vmatpush3.msk.msra.mxu1 %vm2938_vm7, %v2682_v17  ;;  %2418 = vmatprep.mubr.msk.f32.mxu1 %vm2681_vm0, %v2680_v1 }
  0x70   : > { %2421 = vmatprep.subr.mxu0 %v2680_v1  ;;  %2426 = vmatprep.subr.mxu1 %v2680_v1 }
  0x71   : > { %2414 = vmatmul.mubr.msk.f32.vlgmr.msra.gmra.mrb[4].mxu0 %vm290_vm2, %v881_v38  ;;  %2419 = vmatmul.mubr.msk.f32.vlgmr.msra.gmra.mrb[4].mxu1 %vm290_vm2, %v882_v39 }
  0x72   : > { %2422 = vmatpush3.msk.msra.mxu0 %vm2938_vm7, %v2682_v17  ;;  %2423 = vmatprep.mubr.msk.f32.mxu0 %vm2681_vm0, %v2680_v1 }
  0x73   : > { %2427 = vmatpush3.msk.msra.mxu1 %vm2938_vm7, %v2682_v17  ;;  %2428 = vmatprep.mubr.msk.f32.mxu1 %vm2681_vm0, %v2680_v1  ;;  %vm261_vm0 = vcmp.eq.s32.totalorder %v2877_v8, %v254_v53  ;;  %vm255_vm7 = vcmp.eq.s32.totalorder %v2871_v4, %v253_v42 }
  0x74   : > { %v263_v56 = vsel %vm261_vm0, 1.0, %v2680_v1  ;;  %v257_v63 = vsel %vm255_vm7, 1.0, %v2680_v1 }
  0x75   : > { %2424 = vmatmul.mubr.msk.f32.vlgmr.msra.gmra.mrb[6].mxu0 %vm290_vm2, %v883_v40  ;;  %2429 = vmatmul.mubr.msk.f32.vlgmr.msra.gmra.mrb[6].mxu1 %vm290_vm2, %v884_v41 }
  0x76   : > { %2433 = vmatprep.mubr.msk.f32.mxu0 %vm290_vm2, %v262_v43  ;;  %2438 = vmatprep.mubr.msk.f32.mxu1 %vm290_vm2, %v262_v43 }
 0x134   : > { %v652_v44 = vpop.f32.mrb[0].mxu0  ;;  %v725_v45 = vpop.f32.mrb[0].mxu1 }
 0x135   : > { %v2375_v46 = vpop.f32.mrb[1].mxu0  ;;  %v2380_v47 = vpop.f32.mrb[1].mxu1 }
 0x138   : > { %v798_v48 = vpop.f32.mrb[2].mxu0  ;;  %v871_v49 = vpop.f32.mrb[2].mxu1 }
 0x139   : > { %v2385_v50 = vpop.f32.mrb[3].mxu0  ;;  %v2390_v51 = vpop.f32.mrb[3].mxu1 }
 0x144   : > { %v1255_v54 = vpop.f32.mrb[4].mxu0  ;;  %v1328_v55 = vpop.f32.mrb[4].mxu1 }
 0x145   : > { %v2415_v57 = vpop.f32.mrb[5].mxu0  ;;  %v2420_v58 = vpop.f32.mrb[5].mxu1  ;;  %2431 = vmatprep.subr.mxu0 %v1255_v54  ;;  %2436 = vmatprep.subr.mxu1 %v1328_v55 }
 0x146   : > { %2432 = vmatpush3.msra.mxu0 %v1255_v54  ;;  %2437 = vmatpush3.msra.mxu1 %v1328_v55 }
 0x147   : > { %2434 = vmatmul.mubr.msk.f32.vlgmr.msra.gmra.mrb[8].mxu0 %vm290_vm2, %v263_v56  ;;  %2439 = vmatmul.mubr.msk.f32.vlgmr.msra.gmra.mrb[8].mxu1 %vm290_vm2, %v263_v56 }
 0x148   : > { %v1401_v59 = vpop.f32.mrb[6].mxu0  ;;  %v1474_v60 = vpop.f32.mrb[6].mxu1  ;;  %2443 = vmatprep.mubr.msk.f32.mxu0 %vm290_vm2, %v262_v43  ;;  %2448 = vmatprep.mubr.msk.f32.mxu1 %vm290_vm2, %v262_v43 }
 0x149   : > { %v2425_v61 = vpop.f32.mrb[7].mxu0  ;;  %v2430_v62 = vpop.f32.mrb[7].mxu1  ;;  %2441 = vmatprep.subr.mxu0 %v1401_v59  ;;  %2446 = vmatprep.subr.mxu1 %v1474_v60 }
 0x14a   : > { %2442 = vmatpush3.msra.mxu0 %v1401_v59  ;;  %2447 = vmatpush3.msra.mxu1 %v1474_v60 }
 0x14b   : > { %2444 = vmatmul.mubr.msk.f32.vlgmr.msra.gmra.mrb[10].mxu0 %vm290_vm2, %v263_v56  ;;  %2449 = vmatmul.mubr.msk.f32.vlgmr.msra.gmra.mrb[10].mxu1 %vm290_vm2, %v263_v56 }
 0x14c   : > { %2451 = vmatprep.subr.mxu0 %v652_v44  ;;  %2456 = vmatprep.subr.mxu1 %v725_v45 }
 0x14d   : > { %2452 = vmatpush3.msra.mxu0 %v652_v44  ;;  %2457 = vmatpush3.msra.mxu1 %v725_v45 }
 0x14e   : > { %2461 = vmatprep.subr.mxu0 %v798_v48  ;;  %2466 = vmatprep.subr.mxu1 %v871_v49 }
 0x14f   : > { %2453 = vmatprep.mubr.msk.f32.mxu0 %vm290_vm2, %v257_v63  ;;  %2458 = vmatprep.mubr.msk.f32.mxu1 %vm290_vm2, %v257_v63 }
 0x150   : > { %2454 = vmatmul.mubr.msk.f32.vlgmr.msra.gmra.mrb[8].mxu0 %vm290_vm2, %v258_v0  ;;  %2459 = vmatmul.mubr.msk.f32.vlgmr.msra.gmra.mrb[8].mxu1 %vm290_vm2, %v258_v0 }
 0x151   : > { %2462 = vmatpush3.msra.mxu0 %v798_v48  ;;  %2467 = vmatpush3.msra.mxu1 %v871_v49 }
 0x152   : > { %2463 = vmatprep.mubr.msk.f32.mxu0 %vm290_vm2, %v257_v63  ;;  %2468 = vmatprep.mubr.msk.f32.mxu1 %vm290_vm2, %v257_v63 }
 0x154   : > { %2464 = vmatmul.mubr.msk.f32.vlgmr.msra.gmra.mrb[10].mxu0 %vm290_vm2, %v258_v0  ;;  %2469 = vmatmul.mubr.msk.f32.vlgmr.msra.gmra.mrb[10].mxu1 %vm290_vm2, %v258_v0 }
 0x223   : > { %v2455_v1 = vpop.f32.mrb[8].mxu0  ;;  %v2460_v2 = vpop.f32.mrb[8].mxu1 }
 0x224   : > { %2093 = vst.msk [vmem:[%s237_s28 + $0x8] sm:$0x7f] %vm2092_vm9, %v2455_v1  ;;  %2095 = vst.msk [vmem:[%s237_s28 + $0x18] sm:$0x7f] %vm2092_vm9, %v2460_v2  ;;  %v1856_v3 = vpop.f32.mrb[9].mxu0  ;;  %v1931_v4 = vpop.f32.mrb[9].mxu1 }
 0x225   : > { %2091 = vst.msk [vmem:[%s237_s28] sm:$0xff] %vm2090_vm10, %v1856_v3  ;;  %2094 = vst.msk [vmem:[%s237_s28 + $0x10] sm:$0xff] %vm2090_vm10, %v1931_v4 }
 0x227   : > { %v2465_v5 = vpop.f32.mrb[10].mxu0  ;;  %v2470_v6 = vpop.f32.mrb[10].mxu1 }
 0x228   : > { %2097 = vst.msk [vmem:[%s237_s28 + $0x28] sm:$0x7f] %vm2092_vm9, %v2465_v5  ;;  %2099 = vst.msk [vmem:[%s237_s28 + $0x38] sm:$0x7f] %vm2092_vm9, %v2470_v6  ;;  %v2006_v7 = vpop.f32.mrb[11].mxu0  ;;  %v2081_v8 = vpop.f32.mrb[11].mxu1 }
 0x229   : > { %2096 = vst.msk [vmem:[%s237_s28 + $0x20] sm:$0xff] %vm2090_vm10, %v2006_v7  ;;  %2098 = vst.msk [vmem:[%s237_s28 + $0x30] sm:$0xff] %vm2090_vm10, %v2081_v8 }
 0x22a PF: > { %s18_s14 = sadd.s32 1, %s2674_s14   ;;  %s3121_s9 = smov %s2658_s10 }
 0x22b   : > { %p15_p11 = scmp.ge.s32.totalorder %s18_s14, 4   ;;  %s3122_s10 = smov %s2662_s11 }
 0x22c   : > { %s3123_s11 = smov %s2747_s21  ;;  %s3124_s12 = smov %s2670_s13 }
 0x22d   : > { %s3125_s13 = smov %s3127_s16  ;;  %17 = sbr.rel (!%p15_p11) target bundleno = 6 (0x6), region = 81 }
 0x234   :  { %2132 = vsyncpa [#allocation3], 1 }
 0x235   :  { %2134 = vsyncpa [#allocation3 + $0x1], 1 }
 0x236   :  { %2135 = vsyncpa [#allocation5], 1 }
 0x237   :  { %2137 = vsyncpa [#allocation5 + $0x1], 1 }

</bundles_post_ra>
